<compile_context>
chip_gen: v5e
topology: v5e:2x2
jax: 0.10.0
libtpu: 0.0.40
codegen_flags: <defaults>
</compile_context>

<pallas_src>
import jax
import jax.numpy as jnp
from jax.experimental import pallas as pl
from jax.experimental.pallas import tpu as pltpu


def _round_up(v, m):
    return (v + m - 1) // m * m


def _cdiv(a, b):
    return (a + b - 1) // b


def _biaffine_kernel(x_ref, w_ref, yt_ref, o_ref, xw_ref):
    # x_ref : (tm, Dxp)  current Sx tile (bias column + zero-pad fused in).
    # w_ref : (Dxp, Dyp) weight slice for the current n_out index.
    # yt_ref: (Dyp, tn)  pre-transposed y tile -> second matmul is canonical
    #                    (M,K)@(K,N), no per-step transpose.
    # o_ref : (tm, tn)   lane-dense output tile (tn % 128 == 0).
    # xw_ref: (tm, Dyp)  f32 scratch, computed once per (b, o, i).
    #
    # NOTE(correctness): the xw_ref reuse relies on the Sy axis being the
    # innermost grid axis and marked "arbitrary", so j == 0 always runs first
    # for every (b, o, i).  Do not reorder the grid without revisiting this.
    @pl.when(pl.program_id(3) == 0)
    def _():
        xw_ref[...] = jnp.dot(x_ref[...], w_ref[...],
                              preferred_element_type=jnp.float32)

    o_ref[...] = jnp.dot(xw_ref[...].astype(yt_ref.dtype), yt_ref[...],
                         preferred_element_type=jnp.float32).astype(o_ref.dtype)


def _vmem_bytes(tm, tn, Dxp, Dyp, isize, w_bufs):
    return (2 * tm * Dxp * isize          # x tile (double-buffered)
            + 2 * Dyp * tn * isize        # y^T tile (double-buffered)
            + w_bufs * Dxp * Dyp * isize  # weight
            + 2 * tm * tn * 4             # output tile (double-buffered, f32)
            + tm * Dyp * 4)               # xw scratch (f32)


def biaffine(x, y, weight, bias_x=True, bias_y=True, *,
             tm_max=512, tn_max=512, compute_dtype=None,
             single_buffer_weight=True):
    """x: [B, Sx, n_in], y: [B, Sy, n_in],
    weight: [n_out, n_in + bias_x, n_in + bias_y].

    Returns [B, n_out, Sx, Sy] (squeezed to [B, Sx, Sy] when n_out == 1),
    matching the PyTorch module's forward.  Wrap the caller in jax.jit to fuse
    the (single) staging pass per operand with surrounding ops.
    """
    B, Sx, nx = x.shape
    By, Sy, ny = y.shape
    assert B == By
    n_out, Dx, Dy = weight.shape
    assert Dx == nx + int(bias_x) and Dy == ny + int(bias_y), \
        (x.shape, y.shape, weight.shape)

    in_dtype = (jnp.dtype(compute_dtype) if compute_dtype is not None
                else jnp.result_type(x.dtype, y.dtype, weight.dtype))
    isize = jnp.dtype(in_dtype).itemsize

    # Contraction dims zero-padded to 128 lanes (zeros contribute nothing).
    Dxp = _round_up(Dx, 128)
    Dyp = _round_up(Dy, 128)

    # ---- generation-aware tile selection -------------------------------
    try:
        vmem_cap = int(pltpu.get_tpu_info().vmem_capacity_bytes)
    except Exception:
        vmem_cap = 64 << 20  # conservative (v7x per-TC size)
    budget = (96 << 20) if vmem_cap >= (128 << 20) else (48 << 20)

    # Pick tile COUNTS first, then size tiles to minimise sequence padding.
    n_i = max(1, _cdiv(Sx, tm_max))
    n_j = max(1, _cdiv(Sy, tn_max))
    # v7x megacore: ensure >= 2 parallel grid steps when B == n_out == 1.
    if B * n_out * n_i < 2 and Sx > 8:
        n_i = 2
    tm = _round_up(_cdiv(Sx, n_i), 8)      # sublane-aligned
    tn = _round_up(_cdiv(Sy, n_j), 128)    # lane-dense output stores

    w_bufs = 1 if single_buffer_weight else 2
    while _vmem_bytes(tm, tn, Dxp, Dyp, isize, w_bufs) > budget:
        if tm > 8 and (tm * Dxp >= tn * Dyp or tn <= 128):
            tm = max(8, _round_up(tm // 2, 8))
        elif tn > 128:
            tn = max(128, _round_up(tn // 2, 128))
        else:
            break
    footprint = _vmem_bytes(tm, tn, Dxp, Dyp, isize, w_bufs)
    vmem_limit = int(min(max(footprint * 1.25 + (4 << 20), 32 << 20),
                         vmem_cap * 0.9))

    Sxp = _round_up(Sx, tm)
    Syp = _round_up(Sy, tn)

    # ---- staging: fused bias column + lane pad + sequence pad -----------
    xp = jnp.zeros((B, Sxp, Dxp), in_dtype)
    xp = xp.at[:, :Sx, :nx].set(x.astype(in_dtype))
    if bias_x:
        xp = xp.at[:, :Sx, nx].set(1.0)

    # y pre-transposed once at HBM level: [B, Dyp, Syp].
    ytp = jnp.zeros((B, Dyp, Syp), in_dtype)
    ytp = ytp.at[:, :ny, :Sy].set(jnp.swapaxes(y, 1, 2).astype(in_dtype))
    if bias_y:
        ytp = ytp.at[:, ny, :Sy].set(1.0)

    wp = jnp.zeros((n_out, Dxp, Dyp), in_dtype)
    wp = wp.at[:, :Dx, :Dy].set(weight.astype(in_dtype))

    grid = (B, n_out, Sxp // tm, Syp // tn)

    flops = 2 * B * n_out * (Sxp * Dxp * Dyp + Sxp * Syp * Dyp)
    bytes_accessed = (isize * (B * n_out * Sxp * Dxp
                               + B * n_out * (Sxp // tm) * Dyp * Syp
                               + n_out * Dxp * Dyp)
                      + 4 * B * n_out * Sxp * Syp)

    def run(w_pipeline_mode):
        if w_pipeline_mode is not None:
            w_spec = pl.BlockSpec((pl.Squeezed(), Dxp, Dyp),
                                  lambda b, o, i, j: (o, 0, 0),
                                  pipeline_mode=w_pipeline_mode)
        else:
            w_spec = pl.BlockSpec((pl.Squeezed(), Dxp, Dyp),
                                  lambda b, o, i, j: (o, 0, 0))
        return pl.pallas_call(
            _biaffine_kernel,
            out_shape=jax.ShapeDtypeStruct((B, n_out, Sxp, Syp), jnp.float32),
            grid_spec=pltpu.PrefetchScalarGridSpec(
                num_scalar_prefetch=0,
                grid=grid,
                in_specs=[
                    pl.BlockSpec((pl.Squeezed(), tm, Dxp),
                                 lambda b, o, i, j: (b, i, 0)),
                    w_spec,
                    pl.BlockSpec((pl.Squeezed(), Dyp, tn),
                                 lambda b, o, i, j: (b, 0, j)),
                ],
                out_specs=pl.BlockSpec(
                    (pl.Squeezed(), pl.Squeezed(), tm, tn),
                    lambda b, o, i, j: (b, o, i, j)),
                scratch_shapes=[pltpu.VMEM((tm, Dyp), jnp.float32)],
            ),
            compiler_params=pltpu.CompilerParams(
                dimension_semantics=("parallel", "parallel", "parallel",
                                     "arbitrary"),
                vmem_limit_bytes=vmem_limit),
            cost_estimate=pl.CostEstimate(
                flops=int(flops), transcendentals=0,
                bytes_accessed=int(bytes_accessed)),
        )(xp, wp, ytp)

    if single_buffer_weight:
        try:
            out = run(pl.Buffered(1))   # W block changes only once per n_out
        except Exception:
            out = run(None)             # fall back to default double-buffering
    else:
        out = run(None)

    if Sxp != Sx or Syp != Sy:
        out = out[:, :, :Sx, :Sy]
    if n_out == 1:
        out = out[:, 0]  # torch .squeeze(1)
    return out


def biaffine_ref(x, y, weight, bias_x=True, bias_y=True):
    if bias_x:
        x = jnp.concatenate([x, jnp.ones_like(x[..., :1])], axis=-1)
    if bias_y:
        y = jnp.concatenate([y, jnp.ones_like(y[..., :1])], axis=-1)
    s = jnp.einsum('bxi,oij,byj->boxy', x, weight, y)
    if weight.shape[0] == 1:
        s = s[:, 0]
    return s


if __name__ == "__main__":
    key = jax.random.PRNGKey(0)

    # Config 1: module defaults (n_out=1, bias_x=bias_y=True).
    B, Sx, Sy, n_in, n_out = 2, 8, 8, 32, 1
    bias_x = bias_y = True
    kx, ky, kw, key = *jax.random.split(key, 3), jax.random.fold_in(key, 1)
    x = jax.random.normal(kx, (B, Sx, n_in), dtype=jnp.float32)
    y = jax.random.normal(ky, (B, Sy, n_in), dtype=jnp.float32)
    # The module's reset_parameters zero-inits the weight; use a deterministic
    # random weight so the kernel computes something non-trivial.
    weight = jax.random.normal(
        kw, (n_out, n_in + bias_x, n_in + bias_y), dtype=jnp.float32) * 0.1

    out = jax.block_until_ready(biaffine(x, y, weight, bias_x, bias_y))
    ref = biaffine_ref(x, y, weight, bias_x, bias_y)
    assert out.shape == ref.shape, (out.shape, ref.shape)
    assert jnp.allclose(out, ref, atol=1e-4, rtol=1e-4), float(
        jnp.max(jnp.abs(out - ref)))

    # Config 2: rectangular weight (bias_x != bias_y), n_out > 1, Sx != Sy.
    B2, Sx2, Sy2, n_in2, n_out2 = 2, 16, 8, 24, 2
    bx2, by2 = True, False
    kx2, ky2, kw2 = jax.random.split(key, 3)
    x2 = jax.random.normal(kx2, (B2, Sx2, n_in2), dtype=jnp.float32)
    y2 = jax.random.normal(ky2, (B2, Sy2, n_in2), dtype=jnp.float32)
    w2 = jax.random.normal(
        kw2, (n_out2, n_in2 + bx2, n_in2 + by2), dtype=jnp.float32) * 0.1

    out2 = jax.block_until_ready(biaffine(x2, y2, w2, bx2, by2))
    ref2 = biaffine_ref(x2, y2, w2, bx2, by2)
    assert out2.shape == ref2.shape, (out2.shape, ref2.shape)
    assert jnp.allclose(out2, ref2, atol=1e-4, rtol=1e-4), float(
        jnp.max(jnp.abs(out2 - ref2)))

    # Config 3: bf16 compute path (v6e/v7x MXU-friendly); loose tolerance.
    out3 = jax.block_until_ready(
        biaffine(x, y, weight, bias_x, bias_y, compute_dtype=jnp.bfloat16))
    assert out3.shape == ref.shape
    assert jnp.allclose(out3, ref, atol=2e-1, rtol=1e-1), float(
        jnp.max(jnp.abs(out3 - ref)))

    print("KERNEL_OK")
</pallas_src>

<mosaic_0001>
module attributes {stable_mosaic.version = 11 : i64} {
  func.func @_biaffine_kernel(%arg0: i32, %arg1: i32, %arg2: i32, %arg3: i32, %arg4: memref<1x8x128xf32, #tpu.memory_space<vmem>>, %arg5: memref<1x128x128xf32, #tpu.memory_space<vmem>>, %arg6: memref<1x128x128xf32, #tpu.memory_space<vmem>>, %arg7: memref<1x1x8x128xf32, #tpu.memory_space<vmem>>, %arg8: memref<8x128xf32, #tpu.memory_space<vmem>>) attributes {dimension_semantics = [#tpu.dimension_semantics<parallel>, #tpu.dimension_semantics<parallel>, #tpu.dimension_semantics<parallel>, #tpu.dimension_semantics<arbitrary>], iteration_bounds = array<i64: 2, 1, 1, 1>, scalar_prefetch = 0 : i64, scratch_operands = 1 : i64, tpu.core_type = #tpu.core_type<tc>, window_params = [{transform_indices = @transform_0, window_bounds = array<i64: 1, 8, 128>}, {pipeline_mode = #tpu.pipeline_mode<synchronous>, transform_indices = @transform_1, window_bounds = array<i64: 1, 128, 128>}, {transform_indices = @transform_2, window_bounds = array<i64: 1, 128, 128>}, {transform_indices = @transform_3, window_bounds = array<i64: 1, 1, 8, 128>}]} {
    %c0_i32 = arith.constant 0 : i32
    %0 = arith.cmpi eq, %arg3, %c0_i32 : i32
    %1 = arith.extui %0 : i1 to i32
    %c0_i32_0 = arith.constant 0 : i32
    %2 = arith.cmpi ne, %1, %c0_i32_0 : i32
    scf.if %2 {
      %c0_9 = arith.constant 0 : index
      %c0_10 = arith.constant 0 : index
      %c0_11 = arith.constant 0 : index
      %10 = vector.load %arg4[%c0_9, %c0_10, %c0_11] : memref<1x8x128xf32, #tpu.memory_space<vmem>>, vector<1x8x128xf32>
      %11 = vector.shape_cast %10 : vector<1x8x128xf32> to vector<8x128xf32>
      %c0_12 = arith.constant 0 : index
      %c0_13 = arith.constant 0 : index
      %c0_14 = arith.constant 0 : index
      %12 = vector.load %arg5[%c0_12, %c0_13, %c0_14] : memref<1x128x128xf32, #tpu.memory_space<vmem>>, vector<1x128x128xf32>
      %13 = vector.shape_cast %12 : vector<1x128x128xf32> to vector<128x128xf32>
      %cst_15 = arith.constant dense<0.000000e+00> : vector<8x128xf32>
      %14 = tpu.matmul %11, %13, %cst_15 {dimension_numbers = #tpu.dot_dimension_numbers<[1], [0], [0], [1], [0, 0, 1, 1], [], []>} : vector<8x128xf32>, vector<128x128xf32>, vector<8x128xf32> -> vector<8x128xf32>
      %c0_16 = arith.constant 0 : index
      %c0_17 = arith.constant 0 : index
      %15 = vector.load %arg8[%c0_16, %c0_17] : memref<8x128xf32, #tpu.memory_space<vmem>>, vector<8x128xf32>
      tpu.vector_store %arg8[%c0_16, %c0_17], %14 {strides = array<i32>} : memref<8x128xf32, #tpu.memory_space<vmem>>, vector<8x128xf32>,
    } else {
    }
    %c0 = arith.constant 0 : index
    %c0_1 = arith.constant 0 : index
    %3 = vector.load %arg8[%c0, %c0_1] : memref<8x128xf32, #tpu.memory_space<vmem>>, vector<8x128xf32>
    %c0_2 = arith.constant 0 : index
    %c0_3 = arith.constant 0 : index
    %c0_4 = arith.constant 0 : index
    %4 = vector.load %arg6[%c0_2, %c0_3, %c0_4] : memref<1x128x128xf32, #tpu.memory_space<vmem>>, vector<1x128x128xf32>
    %5 = vector.shape_cast %4 : vector<1x128x128xf32> to vector<128x128xf32>
    %cst = arith.constant dense<0.000000e+00> : vector<8x128xf32>
    %6 = tpu.matmul %3, %5, %cst {dimension_numbers = #tpu.dot_dimension_numbers<[1], [0], [0], [1], [0, 0, 1, 1], [], []>} : vector<8x128xf32>, vector<128x128xf32>, vector<8x128xf32> -> vector<8x128xf32>
    %c0_5 = arith.constant 0 : index
    %c0_6 = arith.constant 0 : index
    %c0_7 = arith.constant 0 : index
    %c0_8 = arith.constant 0 : index
    %7 = vector.load %arg7[%c0_5, %c0_6, %c0_7, %c0_8] : memref<1x1x8x128xf32, #tpu.memory_space<vmem>>, vector<1x1x8x128xf32>
    %8 = vector.shape_cast %7 : vector<1x1x8x128xf32> to vector<8x128xf32>
    %9 = vector.shape_cast %6 : vector<8x128xf32> to vector<1x1x8x128xf32>
    tpu.vector_store %arg7[%c0_5, %c0_6, %c0_7, %c0_8], %9 {strides = array<i32>} : memref<1x1x8x128xf32, #tpu.memory_space<vmem>>, vector<1x1x8x128xf32>,
    return
  }
  func.func @transform_0(%arg0: i32, %arg1: i32, %arg2: i32, %arg3: i32) -> (i32, i32, i32) {
    %c0_i32 = arith.constant 0 : i32
    %c0_i32_0 = arith.constant 0 : i32
    return %arg0, %arg2, %c0_i32 : i32, i32, i32
  }
  func.func @transform_1(%arg0: i32, %arg1: i32, %arg2: i32, %arg3: i32) -> (i32, i32, i32) {
    %c0_i32 = arith.constant 0 : i32
    %c0_i32_0 = arith.constant 0 : i32
    %c0_i32_1 = arith.constant 0 : i32
    return %arg1, %c0_i32, %c0_i32_0 : i32, i32, i32
  }
  func.func @transform_2(%arg0: i32, %arg1: i32, %arg2: i32, %arg3: i32) -> (i32, i32, i32) {
    %c0_i32 = arith.constant 0 : i32
    %c0_i32_0 = arith.constant 0 : i32
    return %arg0, %c0_i32, %arg3 : i32, i32, i32
  }
  func.func @transform_3(%arg0: i32, %arg1: i32, %arg2: i32, %arg3: i32) -> (i32, i32, i32, i32) {
    %c0_i32 = arith.constant 0 : i32
    return %arg0, %arg1, %arg2, %arg3 : i32, i32, i32, i32
  }
}

module attributes {stable_mosaic.version = 11 : i64} {
  func.func @_biaffine_kernel(%arg0: i32, %arg1: i32, %arg2: i32, %arg3: i32, %arg4: memref<1x8x128xf32, #tpu.memory_space<vmem>>, %arg5: memref<1x128x128xf32, #tpu.memory_space<vmem>>, %arg6: memref<1x128x128xf32, #tpu.memory_space<vmem>>, %arg7: memref<1x1x8x128xf32, #tpu.memory_space<vmem>>, %arg8: memref<8x128xf32, #tpu.memory_space<vmem>>) attributes {dimension_semantics = [#tpu.dimension_semantics<parallel>, #tpu.dimension_semantics<parallel>, #tpu.dimension_semantics<parallel>, #tpu.dimension_semantics<arbitrary>], iteration_bounds = array<i64: 2, 1, 1, 1>, scalar_prefetch = 0 : i64, scratch_operands = 1 : i64, tpu.core_type = #tpu.core_type<tc>, window_params = [{transform_indices = @transform_0, window_bounds = array<i64: 1, 8, 128>}, {transform_indices = @transform_1, window_bounds = array<i64: 1, 128, 128>}, {transform_indices = @transform_2, window_bounds = array<i64: 1, 128, 128>}, {transform_indices = @transform_3, window_bounds = array<i64: 1, 1, 8, 128>}]} {
    %c0_i32 = arith.constant 0 : i32
    %0 = arith.cmpi eq, %arg3, %c0_i32 : i32
    %1 = arith.extui %0 : i1 to i32
    %c0_i32_0 = arith.constant 0 : i32
    %2 = arith.cmpi ne, %1, %c0_i32_0 : i32
    scf.if %2 {
      %c0_9 = arith.constant 0 : index
      %c0_10 = arith.constant 0 : index
      %c0_11 = arith.constant 0 : index
      %10 = vector.load %arg4[%c0_9, %c0_10, %c0_11] : memref<1x8x128xf32, #tpu.memory_space<vmem>>, vector<1x8x128xf32>
      %11 = vector.shape_cast %10 : vector<1x8x128xf32> to vector<8x128xf32>
      %c0_12 = arith.constant 0 : index
      %c0_13 = arith.constant 0 : index
      %c0_14 = arith.constant 0 : index
      %12 = vector.load %arg5[%c0_12, %c0_13, %c0_14] : memref<1x128x128xf32, #tpu.memory_space<vmem>>, vector<1x128x128xf32>
      %13 = vector.shape_cast %12 : vector<1x128x128xf32> to vector<128x128xf32>
      %cst_15 = arith.constant dense<0.000000e+00> : vector<8x128xf32>
      %14 = tpu.matmul %11, %13, %cst_15 {dimension_numbers = #tpu.dot_dimension_numbers<[1], [0], [0], [1], [0, 0, 1, 1], [], []>} : vector<8x128xf32>, vector<128x128xf32>, vector<8x128xf32> -> vector<8x128xf32>
      %c0_16 = arith.constant 0 : index
      %c0_17 = arith.constant 0 : index
      %15 = vector.load %arg8[%c0_16, %c0_17] : memref<8x128xf32, #tpu.memory_space<vmem>>, vector<8x128xf32>
      tpu.vector_store %arg8[%c0_16, %c0_17], %14 {strides = array<i32>} : memref<8x128xf32, #tpu.memory_space<vmem>>, vector<8x128xf32>,
    } else {
    }
    %c0 = arith.constant 0 : index
    %c0_1 = arith.constant 0 : index
    %3 = vector.load %arg8[%c0, %c0_1] : memref<8x128xf32, #tpu.memory_space<vmem>>, vector<8x128xf32>
    %c0_2 = arith.constant 0 : index
    %c0_3 = arith.constant 0 : index
    %c0_4 = arith.constant 0 : index
    %4 = vector.load %arg6[%c0_2, %c0_3, %c0_4] : memref<1x128x128xf32, #tpu.memory_space<vmem>>, vector<1x128x128xf32>
    %5 = vector.shape_cast %4 : vector<1x128x128xf32> to vector<128x128xf32>
    %cst = arith.constant dense<0.000000e+00> : vector<8x128xf32>
    %6 = tpu.matmul %3, %5, %cst {dimension_numbers = #tpu.dot_dimension_numbers<[1], [0], [0], [1], [0, 0, 1, 1], [], []>} : vector<8x128xf32>, vector<128x128xf32>, vector<8x128xf32> -> vector<8x128xf32>
    %c0_5 = arith.constant 0 : index
    %c0_6 = arith.constant 0 : index
    %c0_7 = arith.constant 0 : index
    %c0_8 = arith.constant 0 : index
    %7 = vector.load %arg7[%c0_5, %c0_6, %c0_7, %c0_8] : memref<1x1x8x128xf32, #tpu.memory_space<vmem>>, vector<1x1x8x128xf32>
    %8 = vector.shape_cast %7 : vector<1x1x8x128xf32> to vector<8x128xf32>
    %9 = vector.shape_cast %6 : vector<8x128xf32> to vector<1x1x8x128xf32>
    tpu.vector_store %arg7[%c0_5, %c0_6, %c0_7, %c0_8], %9 {strides = array<i32>} : memref<1x1x8x128xf32, #tpu.memory_space<vmem>>, vector<1x1x8x128xf32>,
    return
  }
  func.func @transform_0(%arg0: i32, %arg1: i32, %arg2: i32, %arg3: i32) -> (i32, i32, i32) {
    %c0_i32 = arith.constant 0 : i32
    %c0_i32_0 = arith.constant 0 : i32
    return %arg0, %arg2, %c0_i32 : i32, i32, i32
  }
  func.func @transform_1(%arg0: i32, %arg1: i32, %arg2: i32, %arg3: i32) -> (i32, i32, i32) {
    %c0_i32 = arith.constant 0 : i32
    %c0_i32_0 = arith.constant 0 : i32
    %c0_i32_1 = arith.constant 0 : i32
    return %arg1, %c0_i32, %c0_i32_0 : i32, i32, i32
  }
  func.func @transform_2(%arg0: i32, %arg1: i32, %arg2: i32, %arg3: i32) -> (i32, i32, i32) {
    %c0_i32 = arith.constant 0 : i32
    %c0_i32_0 = arith.constant 0 : i32
    return %arg0, %c0_i32, %arg3 : i32, i32, i32
  }
  func.func @transform_3(%arg0: i32, %arg1: i32, %arg2: i32, %arg3: i32) -> (i32, i32, i32, i32) {
    %c0_i32 = arith.constant 0 : i32
    return %arg0, %arg1, %arg2, %arg3 : i32, i32, i32, i32
  }
}

</mosaic_0001>

<bundles_post_ra>
// kernel: tpu_custom_call.1
= control target key start
LH: loop header
LB: loop body
LE: loop exit
PB: predicated region body
PF: predicated region fallthrough
CT: control target
= control target key end

     0   :  { %8 = vsyncpa [#allocation4], 0  ;;  %s1008_s0 = inlined_call_operand.hbm [shape: f32[2,8,128], index: 0, kind: input, shape index: {}]   ;;  %s1009_s1 = inlined_call_operand.hbm [shape: f32[1,128,128], index: 1, kind: input, shape index: {}]   ;;  %s1010_s2 = inlined_call_operand.hbm [shape: f32[2,128,128], index: 2, kind: input, shape index: {}]   ;;  %s1011_s3 = inlined_call_operand.hbm [shape: f32[2,1,8,128], index: 3, kind: output, shape index: {}]  }
   0x1   :  { %10 = vsyncpa [#allocation4 + $0x1], 0 }
   0x2   :  { %11 = vsyncpa [#allocation7], 0 }
   0x3   :  { %12 = vsyncpa [#allocation5], 0 }
   0x4   :  { %14 = vsyncpa [#allocation5 + $0x1], 0  ;;  %s816_s12 = smov 0   ;;  %s818_s13 = smov 0  }
   0x5   :  { %s820_s14 = smov 0   ;;  %s822_s15 = smov 0  }
   0x6   :  { %s824_s16 = smov 0   ;;  %s826_s17 = smov 0  }
   0x7 LB: > { %s847_s18 = sadd.s32 4294967295, %s791_s17   ;;  %s512_s19 = sadd.s32 4294967294, %s791_s17   ;;  %s791_s17 = sphi %s826_s17, %s20_s17   ;;  %s787_s16 = sphi %s824_s16, %s1022_s16   ;;  %s783_s15 = sphi %s822_s15, %s1021_s15   ;;  %s779_s14 = sphi %s820_s14, %s1020_s14   ;;  %s775_s13 = sphi %s818_s13, %s1019_s13   ;;  %s771_s12 = sphi %s816_s12, %s1018_s12  }
   0x8   : > { %s46_s20 = sadd.s32 1, %s787_s16  ;;  %s55_s21 = sadd.s32 1, %s779_s14 }
   0x9   : > { %p48_p0 = scmp.ge.s32.totalorder %s46_s20, 2  ;;  %p62_p1 = scmp.ne.s32.totalorder %s779_s14, %s775_s13 }
   0xa   : > { %p63_p2 = scmp.eq.s32.totalorder %s791_s17, 0  ;;  %p68_p3 = scmp.ne.s32.totalorder %s775_s13, %s771_s12 }
   0xb   : > { %s1024_s20 = smov (%p48_p0, %s46_s20), 0  ;;  %p152_p5 = scmp.eq.s32.totalorder %s847_s18, 1 }
   0xc   : > { %p859_p4 = por %p63_p2, %p62_p1  ;;  %s50_s23 = ssub.s32 %s787_s16, %s1024_s20 }
   0xd   : > { %p158_p6 = scmp.eq.s32.totalorder %s512_s19, 1  ;;  %p53_p7 = scmp.eq.s32.totalorder %s50_s23, 0 }
   0xe   : > { %p866_p8 = por %p152_p5, %p62_p1  ;;  %p515_p10 = scmp.ge.s32.totalorder %s791_s17, 2 }
   0xf   : > { %p873_p9 = por %p158_p6, %p68_p3  ;;  %p557_p11 = scmp.lt.s32.totalorder %s791_s17, 2 }
  0x10   : > { %s878_s26 = scalar_select %p53_p7, %s779_s14, %s55_s21  }
  0x11   : > { %s195_s27 = sand.u32 1, %s791_s17   ;;  %s197_s28 = sand.u32 1, %s779_s14  }
  0x12   : > { %s516_s29 = sshll.u32 %s197_s28, 3  ;;  %s517_s30 = sshll.u32 %s787_s16, 3 }
  0x13   : > { %s204_s6 = scalar_lea.hbm %s1008_s0, %s517_s30  ;;  %s199_s7 = scalar_lea.vmem [#allocation3], %s516_s29 }
  0x14   : > { %s208_s8 = sshll.u32 %s199_s7, 4  ;;  %s206_s9 = sshll.u32 %s204_s6, 4  ;;  %s209_s8 = int_to_ptr.vmem [resolvable:$true] %s208_s8  ;;  %s207_s9 = int_to_ptr.hbm [resolvable:$true] %s206_s9 }
  0x15   : > { %p890_p12 = pnand %p557_p11, %p859_p4  ;;  %s518_s11 = sshll.u32 %s197_s28, 7 }
  0x16   : > { %s196_s19 = scalar_lea.sflag [#allocation4], %s195_s27  ;;  %s530_s21 = sshll.u32 %s787_s16, 7 }
  0x17   : > { %548 = dma.hbm_to_vmem [thread:$0]  (!%p890_p12), %s207_s9, 128, %s209_s8, %s196_s19  }
  0x18   : > { %s219_s23 = scalar_lea.vmem [#allocation8], %s518_s11  ;;  %p69_p13 = scmp.eq.s32.totalorder %s847_s18, 0 }
  0x19   : > { %s228_s29 = sshll.u32 %s219_s23, 4  ;;  %p513_p0 = scmp.ge.s32.totalorder %s791_s17, 1  ;;  %s229_s29 = int_to_ptr.vmem [resolvable:$true] %s228_s29 }
  0x1a   : > { %p165_p1 = scmp.lt.s32.totalorder %s791_s17, 3  ;;  %s179_s22 = sshll.u32 %s1009_s1, 4  ;;  %s180_s22 = int_to_ptr.hbm [resolvable:$true] %s179_s22 }
  0x1b   : > { %p908_p2 = por %p69_p13, %p68_p3  ;;  %s793_s28 = smov [#allocation6]  }
  0x1c   : > { %p912_p4 = pnand %p513_p0, %p165_p1  ;;  %s181_s6 = sshll.u32 %s793_s28, 4  ;;  %s182_s6 = int_to_ptr.vmem [resolvable:$true] %s181_s6 }
  0x1d   : > { %s225_s9 = scalar_lea.hbm %s1010_s2, %s530_s21  ;;  %s794_s23 = smov 128  }
  0x1e   : > { %p541_p5 = pneg %p912_p4  ;;  %s226_s11 = sshll.u32 %s225_s9, 4  ;;  %s227_s11 = int_to_ptr.hbm [resolvable:$true] %s226_s11 }
  0x1f   : > { %s795_s30 = smov 8   ;;  %240 = sbr.rel (%p912_p4) target bundleno = 331 (0x14b), region = 32 }
  0x20   : > { %p542_p3 = pnand %p541_p5, %p69_p13  ;;  %s242_s4 = sand.u32 (!%p912_p4), 1, %s847_s18  }
  0x21   : > { %551 = dma.hbm_to_vmem [thread:$0]  (!%p890_p12), %s227_s11, 2048, %s229_s29, %s196_s19, %s794_s23, %s794_s23, %s795_s30  }
  0x22   : > { %544 = dma.hbm_to_vmem [thread:$0]  (!%p542_p3), %s180_s22, 2048, %s182_s6, [#allocation7], %s794_s23, %s794_s23, %s795_s30  }
  0x23   : > { %s929_s28 = sand.u32 (!%p912_p4), 1, %s775_s13   ;;  %s243_s7 = scalar_lea.sflag (!%p912_p4), [#allocation4], %s242_s4 }
  0x24   : > { %s522_s21 = sshll.u32 %s929_s28, 3 }
  0x25   : > { %s934_s8 = scalar_lea.vmem [#allocation3], %s522_s21 }
  0x26   : > { %754 = dma.done.wait (%p908_p2), %s243_s7, 128  }
  0x27   : > { %756 = vsyncadd (%p908_p2), %s243_s7, 4294967168 }
  0x28   : > { %758 = dma.done.wait (%p69_p13), [#allocation7], 2048  }
  0x29   : > { %760 = vsyncadd (%p69_p13), [#allocation7], 4294965248  ;;  %s524_s10 = sshll.u32 %s929_s28, 7 }
  0x2a   : > { %s945_s19 = scalar_lea.vmem [#allocation8], %s524_s10 }
  0x2b   : > { %762 = dma.done.wait (%p908_p2), %s243_s7, 2048  }
  0x2c   : > { %764 = vsyncadd (%p908_p2), %s243_s7, 4294965248  ;;  %v310_v0 = vld [vmem:[#allocation6 + $0x78] sm:$0xff]  ;;  %v309_v1 = vld [vmem:[#allocation6 + $0x70] sm:$0xff]  ;;  %s527_s18 = sshll.u32 %s783_s15, 3  ;;  %s289_s27 = scalar_lea.vmem [#allocation9], %s522_s21 }
  0x2d   : > { %311 = vmatpush.msra.mxu0 %v310_v0  ;;  %v308_v2 = vld [vmem:[#allocation6 + $0x68] sm:$0xff]  ;;  %v307_v3 = vld [vmem:[#allocation6 + $0x60] sm:$0xff]  ;;  %v348_v4 = vld [vmem:[%s945_s19 + $0x78] sm:$0xff]  ;;  %s384_s5 = scalar_lea.hbm %s1011_s3, %s527_s18  ;;  %s386_s6 = sshll.u32 %s289_s27, 4  ;;  %s387_s6 = int_to_ptr.vmem [resolvable:$true] %s386_s6 }
  0x2e   : > { %v306_v5 = vld [vmem:[#allocation6 + $0x58] sm:$0xff]  ;;  %349 = vmatpush.msra.mxu1 %v348_v4  ;;  %v347_v6 = vld [vmem:[%s945_s19 + $0x70] sm:$0xff]  ;;  %v346_v7 = vld [vmem:[%s945_s19 + $0x68] sm:$0xff]  ;;  %s388_s9 = sshll.u32 %s384_s5, 4  ;;  %s371_s11 = scalar_lea.sflag [#allocation5], %s929_s28  ;;  %s389_s9 = int_to_ptr.hbm [resolvable:$true] %s388_s9 }
  0x2f   : > { %312 = vmatpush.msra.mxu0 %v309_v1  ;;  %v305_v8 = vld [vmem:[#allocation6 + $0x50] sm:$0xff]  ;;  %v345_v9 = vld [vmem:[%s945_s19 + $0x60] sm:$0xff]  ;;  %v304_v10 = vld [vmem:[#allocation6 + $0x48] sm:$0xff]  ;;  %s715_s23 = sshra.s32 %s389_s9, 4  ;;  %s721_s7 = scalar_lea.hbm %s1011_s3, 16  ;;  %s716_s23 = int_to_ptr.hbm [resolvable:$true] %s715_s23 }
  0x30   : > { %350 = vmatpush.msra.mxu1 %v347_v6  ;;  %v344_v11 = vld [vmem:[%s945_s19 + $0x58] sm:$0xff]  ;;  %v303_v12 = vld [vmem:[#allocation6 + $0x40] sm:$0xff]  ;;  %v343_v13 = vld [vmem:[%s945_s19 + $0x50] sm:$0xff]  ;;  %s717_s30 = scalar_lea.hbm %s716_s23, 8  ;;  %p722_p12 = scmp.lt.s32.totalorder %s716_s23, %s1011_s3 }
  0x31   : > { %313 = vmatpush.msra.mxu0 %v308_v2  ;;  %v302_v14 = vld [vmem:[#allocation6 + $0x38] sm:$0xff]  ;;  %v342_v15 = vld [vmem:[%s945_s19 + $0x48] sm:$0xff]  ;;  %v301_v16 = vld [vmem:[#allocation6 + $0x30] sm:$0xff]  ;;  %p718_p6 = scmp.ne.s32.totalorder %s716_s23, %s717_s30  ;;  %p723_p13 = scmp.lt.s32.totalorder %s721_s7, %s717_s30 }
  0x32   : > { %351 = vmatpush.msra.mxu1 %v346_v7  ;;  %v341_v17 = vld [vmem:[%s945_s19 + $0x40] sm:$0xff]  ;;  %v300_v18 = vld [vmem:[#allocation6 + $0x28] sm:$0xff]  ;;  %v340_v19 = vld [vmem:[%s945_s19 + $0x38] sm:$0xff] }
  0x33   : > { %314 = vmatpush.msra.mxu0 %v307_v3  ;;  %v299_v20 = vld [vmem:[#allocation6 + $0x20] sm:$0xff]  ;;  %v339_v21 = vld [vmem:[%s945_s19 + $0x30] sm:$0xff]  ;;  %v298_v22 = vld [vmem:[#allocation6 + $0x18] sm:$0xff]  ;;  %p719_p7 = pnand %p718_p6, %p866_p8  ;;  %p724_p0 = por %p723_p13, %p722_p12 }
  0x34   : > { %352 = vmatpush.msra.mxu1 %v345_v9  ;;  %v338_v23 = vld [vmem:[%s945_s19 + $0x28] sm:$0xff]  ;;  %v297_v24 = vld [vmem:[#allocation6 + $0x10] sm:$0xff]  ;;  %v337_v25 = vld [vmem:[%s945_s19 + $0x20] sm:$0xff] }
  0x35   : > { %315 = vmatpush.msra.mxu0 %v306_v5  ;;  %v296_v26 = vld [vmem:[#allocation6 + $0x8] sm:$0xff]  ;;  %v336_v27 = vld [vmem:[%s945_s19 + $0x18] sm:$0xff]  ;;  %v295_v28 = vld [vmem:[#allocation6] sm:$0xff]  ;;  %p720_p11 = pneg %p719_p7 }
  0x36   : > { %353 = vmatpush.msra.mxu1 %v344_v11  ;;  %v294_v29 = vld [vmem:[%s934_s8] sm:$0xff]  ;;  %v334_v31 = vld [vmem:[%s945_s19 + $0x8] sm:$0xff]  ;;  %v333_v32 = vld [vmem:[%s945_s19] sm:$0xff] }
  0x37   : > { %316 = vmatpush.msra.mxu0 %v305_v8  ;;  %v335_v30 = vld [vmem:[%s945_s19 + $0x10] sm:$0xff]  ;;  %p725_p1 = pnand %p724_p0, %p720_p11 }
  0x38   : > { %354 = vmatpush.msra.mxu1 %v343_v13 }
  0x39   : > { %317 = vmatpush.msra.mxu0 %v304_v10 }
  0x3a   : > { %355 = vmatpush.msra.mxu1 %v342_v15 }
  0x3b   : > { %318 = vmatpush.msra.mxu0 %v303_v12 }
  0x3c   : > { %356 = vmatpush.msra.mxu1 %v341_v17 }
  0x3d   : > { %319 = vmatpush.msra.mxu0 %v302_v14 }
  0x3e   : > { %357 = vmatpush.msra.mxu1 %v340_v19 }
  0x3f   : > { %320 = vmatpush.msra.mxu0 %v301_v16 }
  0x40   : > { %358 = vmatpush.msra.mxu1 %v339_v21 }
  0x41   : > { %321 = vmatpush.msra.mxu0 %v300_v18 }
  0x42   : > { %359 = vmatpush.msra.mxu1 %v338_v23 }
  0x43   : > { %322 = vmatpush.msra.mxu0 %v299_v20 }
  0x44   : > { %360 = vmatpush.msra.mxu1 %v337_v25 }
  0x45   : > { %323 = vmatpush.msra.mxu0 %v298_v22 }
  0x46   : > { %361 = vmatpush.msra.mxu1 %v336_v27 }
  0x47   : > { %324 = vmatpush.msra.mxu0 %v297_v24 }
  0x48   : > { %362 = vmatpush.msra.mxu1 %v335_v30 }
  0x49   : > { %325 = vmatpush.msra.mxu0 %v296_v26 }
  0x4a   : > { %363 = vmatpush.msra.mxu1 %v334_v31 }
  0x4b   : > { %326 = vmatpush.msra.mxu0 %v295_v28 }
  0x4c   : > { %327 = vmatmul.f32.vlgmr.msra.gmra.mxu0 %v294_v29  ;;  %364 = vmatpush.msra.mxu1 %v333_v32 }
  0xc9   : > { %v328_v33 = vpop.f32.mrf.mxu0 }
  0xca   : > { %365 = vmatmul.f32.vlgmr.msra.gmra.mxu1 %v328_v33 }
 0x147   : > { %v366_v34 = vpop.f32.mrf.mxu1 }
 0x148   : > { %369 = vst [vmem:[%s289_s27] sm:$0xff] %v366_v34 }
 0x149   : > { %728 = shalt.err (!%p725_p1)
}
 0x14a   : > { %539 = dma.vmem_to_hbm [thread:$0]  (%p866_p8), %s387_s6, 128, %s389_s9, %s371_s11  }
 0x14b PF: > { %s400_s28 = sand.u32 1, %s771_s12   ;;  %p553_p2 = pnand %p515_p10, %p873_p9 }
 0x14c   : > { %s401_s10 = scalar_lea.sflag [#allocation5], %s400_s28 }
 0x14d   : > { %p554_p4 = pneg %p553_p2 }
 0x14f   : > { %766 = dma.done.wait (%p554_p4), %s401_s10, 128  }
 0x150   : > { %768 = vsyncadd (%p554_p4), %s401_s10, 4294967168  ;;  %s20_s17 = sadd.s32 1, %s791_s17   ;;  %s1018_s12 = smov %s775_s13 }
 0x151   : > { %p17_p5 = scmp.ge.s32.totalorder %s20_s17, 4   ;;  %s1019_s13 = smov %s779_s14 }
 0x152   : > { %s1020_s14 = smov %s878_s26  ;;  %s1021_s15 = smov %s787_s16 }
 0x153   : > { %s1022_s16 = smov %s1024_s20  ;;  %19 = sbr.rel (!%p17_p5) target bundleno = 7 (0x7), region = 97 }
 0x158   :  { %407 = vsyncpa [#allocation4], 1 }
 0x159   :  { %409 = vsyncpa [#allocation4 + $0x1], 1 }
 0x15a   :  { %410 = vsyncpa [#allocation7], 1 }
 0x15b   :  { %411 = vsyncpa [#allocation5], 1 }
 0x15c   :  { %413 = vsyncpa [#allocation5 + $0x1], 1 }

// kernel: tpu_custom_call.1
= control target key start
LH: loop header
LB: loop body
LE: loop exit
PB: predicated region body
PF: predicated region fallthrough
CT: control target
= control target key end

     0   :  { %8 = vsyncpa [#allocation4], 0  ;;  %s1008_s0 = inlined_call_operand.hbm [shape: f32[2,8,128], index: 0, kind: input, shape index: {}]   ;;  %s1009_s1 = inlined_call_operand.hbm [shape: f32[1,128,128], index: 1, kind: input, shape index: {}]   ;;  %s1010_s2 = inlined_call_operand.hbm [shape: f32[2,128,128], index: 2, kind: input, shape index: {}]   ;;  %s1011_s3 = inlined_call_operand.hbm [shape: f32[2,1,8,128], index: 3, kind: output, shape index: {}]  }
   0x1   :  { %10 = vsyncpa [#allocation4 + $0x1], 0 }
   0x2   :  { %11 = vsyncpa [#allocation7], 0 }
   0x3   :  { %12 = vsyncpa [#allocation5], 0 }
   0x4   :  { %14 = vsyncpa [#allocation5 + $0x1], 0  ;;  %s816_s12 = smov 0   ;;  %s818_s13 = smov 0  }
   0x5   :  { %s820_s14 = smov 0   ;;  %s822_s15 = smov 0  }
   0x6   :  { %s824_s16 = smov 0   ;;  %s826_s17 = smov 0  }
   0x7 LB: > { %s847_s18 = sadd.s32 4294967295, %s791_s17   ;;  %s512_s19 = sadd.s32 4294967294, %s791_s17   ;;  %s791_s17 = sphi %s826_s17, %s20_s17   ;;  %s787_s16 = sphi %s824_s16, %s1022_s16   ;;  %s783_s15 = sphi %s822_s15, %s1021_s15   ;;  %s779_s14 = sphi %s820_s14, %s1020_s14   ;;  %s775_s13 = sphi %s818_s13, %s1019_s13   ;;  %s771_s12 = sphi %s816_s12, %s1018_s12  }
   0x8   : > { %s46_s20 = sadd.s32 1, %s787_s16  ;;  %s55_s21 = sadd.s32 1, %s779_s14 }
   0x9   : > { %p48_p0 = scmp.ge.s32.totalorder %s46_s20, 2  ;;  %p62_p1 = scmp.ne.s32.totalorder %s779_s14, %s775_s13 }
   0xa   : > { %p63_p2 = scmp.eq.s32.totalorder %s791_s17, 0  ;;  %p68_p3 = scmp.ne.s32.totalorder %s775_s13, %s771_s12 }
   0xb   : > { %s1024_s20 = smov (%p48_p0, %s46_s20), 0  ;;  %p152_p5 = scmp.eq.s32.totalorder %s847_s18, 1 }
   0xc   : > { %p859_p4 = por %p63_p2, %p62_p1  ;;  %s50_s23 = ssub.s32 %s787_s16, %s1024_s20 }
   0xd   : > { %p158_p6 = scmp.eq.s32.totalorder %s512_s19, 1  ;;  %p53_p7 = scmp.eq.s32.totalorder %s50_s23, 0 }
   0xe   : > { %p866_p8 = por %p152_p5, %p62_p1  ;;  %p515_p10 = scmp.ge.s32.totalorder %s791_s17, 2 }
   0xf   : > { %p873_p9 = por %p158_p6, %p68_p3  ;;  %p557_p11 = scmp.lt.s32.totalorder %s791_s17, 2 }
  0x10   : > { %s878_s26 = scalar_select %p53_p7, %s779_s14, %s55_s21  }
  0x11   : > { %s195_s27 = sand.u32 1, %s791_s17   ;;  %s197_s28 = sand.u32 1, %s779_s14  }
  0x12   : > { %s516_s29 = sshll.u32 %s197_s28, 3  ;;  %s517_s30 = sshll.u32 %s787_s16, 3 }
  0x13   : > { %s204_s6 = scalar_lea.hbm %s1008_s0, %s517_s30  ;;  %s199_s7 = scalar_lea.vmem [#allocation3], %s516_s29 }
  0x14   : > { %s208_s8 = sshll.u32 %s199_s7, 4  ;;  %s206_s9 = sshll.u32 %s204_s6, 4  ;;  %s209_s8 = int_to_ptr.vmem [resolvable:$true] %s208_s8  ;;  %s207_s9 = int_to_ptr.hbm [resolvable:$true] %s206_s9 }
  0x15   : > { %p890_p12 = pnand %p557_p11, %p859_p4  ;;  %s518_s11 = sshll.u32 %s197_s28, 7 }
  0x16   : > { %s196_s19 = scalar_lea.sflag [#allocation4], %s195_s27  ;;  %s530_s21 = sshll.u32 %s787_s16, 7 }
  0x17   : > { %548 = dma.hbm_to_vmem [thread:$0]  (!%p890_p12), %s207_s9, 128, %s209_s8, %s196_s19  }
  0x18   : > { %s219_s23 = scalar_lea.vmem [#allocation8], %s518_s11  ;;  %p69_p13 = scmp.eq.s32.totalorder %s847_s18, 0 }
  0x19   : > { %s228_s29 = sshll.u32 %s219_s23, 4  ;;  %p513_p0 = scmp.ge.s32.totalorder %s791_s17, 1  ;;  %s229_s29 = int_to_ptr.vmem [resolvable:$true] %s228_s29 }
  0x1a   : > { %p165_p1 = scmp.lt.s32.totalorder %s791_s17, 3  ;;  %s179_s22 = sshll.u32 %s1009_s1, 4  ;;  %s180_s22 = int_to_ptr.hbm [resolvable:$true] %s179_s22 }
  0x1b   : > { %p908_p2 = por %p69_p13, %p68_p3  ;;  %s793_s28 = smov [#allocation6]  }
  0x1c   : > { %p912_p4 = pnand %p513_p0, %p165_p1  ;;  %s181_s6 = sshll.u32 %s793_s28, 4  ;;  %s182_s6 = int_to_ptr.vmem [resolvable:$true] %s181_s6 }
  0x1d   : > { %s225_s9 = scalar_lea.hbm %s1010_s2, %s530_s21  ;;  %s794_s23 = smov 128  }
  0x1e   : > { %p541_p5 = pneg %p912_p4  ;;  %s226_s11 = sshll.u32 %s225_s9, 4  ;;  %s227_s11 = int_to_ptr.hbm [resolvable:$true] %s226_s11 }
  0x1f   : > { %s795_s30 = smov 8   ;;  %240 = sbr.rel (%p912_p4) target bundleno = 331 (0x14b), region = 32 }
  0x20   : > { %p542_p3 = pnand %p541_p5, %p69_p13  ;;  %s242_s4 = sand.u32 (!%p912_p4), 1, %s847_s18  }
  0x21   : > { %551 = dma.hbm_to_vmem [thread:$0]  (!%p890_p12), %s227_s11, 2048, %s229_s29, %s196_s19, %s794_s23, %s794_s23, %s795_s30  }
  0x22   : > { %544 = dma.hbm_to_vmem [thread:$0]  (!%p542_p3), %s180_s22, 2048, %s182_s6, [#allocation7], %s794_s23, %s794_s23, %s795_s30  }
  0x23   : > { %s929_s28 = sand.u32 (!%p912_p4), 1, %s775_s13   ;;  %s243_s7 = scalar_lea.sflag (!%p912_p4), [#allocation4], %s242_s4 }
  0x24   : > { %s522_s21 = sshll.u32 %s929_s28, 3 }
  0x25   : > { %s934_s8 = scalar_lea.vmem [#allocation3], %s522_s21 }
  0x26   : > { %754 = dma.done.wait (%p908_p2), %s243_s7, 128  }
  0x27   : > { %756 = vsyncadd (%p908_p2), %s243_s7, 4294967168 }
  0x28   : > { %758 = dma.done.wait (%p69_p13), [#allocation7], 2048  }
  0x29   : > { %760 = vsyncadd (%p69_p13), [#allocation7], 4294965248  ;;  %s524_s10 = sshll.u32 %s929_s28, 7 }
  0x2a   : > { %s945_s19 = scalar_lea.vmem [#allocation8], %s524_s10 }
  0x2b   : > { %762 = dma.done.wait (%p908_p2), %s243_s7, 2048  }
  0x2c   : > { %764 = vsyncadd (%p908_p2), %s243_s7, 4294965248  ;;  %v310_v0 = vld [vmem:[#allocation6 + $0x78] sm:$0xff]  ;;  %v309_v1 = vld [vmem:[#allocation6 + $0x70] sm:$0xff]  ;;  %s527_s18 = sshll.u32 %s783_s15, 3  ;;  %s289_s27 = scalar_lea.vmem [#allocation9], %s522_s21 }
  0x2d   : > { %311 = vmatpush.msra.mxu0 %v310_v0  ;;  %v308_v2 = vld [vmem:[#allocation6 + $0x68] sm:$0xff]  ;;  %v307_v3 = vld [vmem:[#allocation6 + $0x60] sm:$0xff]  ;;  %v348_v4 = vld [vmem:[%s945_s19 + $0x78] sm:$0xff]  ;;  %s384_s5 = scalar_lea.hbm %s1011_s3, %s527_s18  ;;  %s386_s6 = sshll.u32 %s289_s27, 4  ;;  %s387_s6 = int_to_ptr.vmem [resolvable:$true] %s386_s6 }
  0x2e   : > { %v306_v5 = vld [vmem:[#allocation6 + $0x58] sm:$0xff]  ;;  %349 = vmatpush.msra.mxu1 %v348_v4  ;;  %v347_v6 = vld [vmem:[%s945_s19 + $0x70] sm:$0xff]  ;;  %v346_v7 = vld [vmem:[%s945_s19 + $0x68] sm:$0xff]  ;;  %s388_s9 = sshll.u32 %s384_s5, 4  ;;  %s371_s11 = scalar_lea.sflag [#allocation5], %s929_s28  ;;  %s389_s9 = int_to_ptr.hbm [resolvable:$true] %s388_s9 }
  0x2f   : > { %312 = vmatpush.msra.mxu0 %v309_v1  ;;  %v305_v8 = vld [vmem:[#allocation6 + $0x50] sm:$0xff]  ;;  %v345_v9 = vld [vmem:[%s945_s19 + $0x60] sm:$0xff]  ;;  %v304_v10 = vld [vmem:[#allocation6 + $0x48] sm:$0xff]  ;;  %s715_s23 = sshra.s32 %s389_s9, 4  ;;  %s721_s7 = scalar_lea.hbm %s1011_s3, 16  ;;  %s716_s23 = int_to_ptr.hbm [resolvable:$true] %s715_s23 }
  0x30   : > { %350 = vmatpush.msra.mxu1 %v347_v6  ;;  %v344_v11 = vld [vmem:[%s945_s19 + $0x58] sm:$0xff]  ;;  %v303_v12 = vld [vmem:[#allocation6 + $0x40] sm:$0xff]  ;;  %v343_v13 = vld [vmem:[%s945_s19 + $0x50] sm:$0xff]  ;;  %s717_s30 = scalar_lea.hbm %s716_s23, 8  ;;  %p722_p12 = scmp.lt.s32.totalorder %s716_s23, %s1011_s3 }
  0x31   : > { %313 = vmatpush.msra.mxu0 %v308_v2  ;;  %v302_v14 = vld [vmem:[#allocation6 + $0x38] sm:$0xff]  ;;  %v342_v15 = vld [vmem:[%s945_s19 + $0x48] sm:$0xff]  ;;  %v301_v16 = vld [vmem:[#allocation6 + $0x30] sm:$0xff]  ;;  %p718_p6 = scmp.ne.s32.totalorder %s716_s23, %s717_s30  ;;  %p723_p13 = scmp.lt.s32.totalorder %s721_s7, %s717_s30 }
  0x32   : > { %351 = vmatpush.msra.mxu1 %v346_v7  ;;  %v341_v17 = vld [vmem:[%s945_s19 + $0x40] sm:$0xff]  ;;  %v300_v18 = vld [vmem:[#allocation6 + $0x28] sm:$0xff]  ;;  %v340_v19 = vld [vmem:[%s945_s19 + $0x38] sm:$0xff] }
  0x33   : > { %314 = vmatpush.msra.mxu0 %v307_v3  ;;  %v299_v20 = vld [vmem:[#allocation6 + $0x20] sm:$0xff]  ;;  %v339_v21 = vld [vmem:[%s945_s19 + $0x30] sm:$0xff]  ;;  %v298_v22 = vld [vmem:[#allocation6 + $0x18] sm:$0xff]  ;;  %p719_p7 = pnand %p718_p6, %p866_p8  ;;  %p724_p0 = por %p723_p13, %p722_p12 }
  0x34   : > { %352 = vmatpush.msra.mxu1 %v345_v9  ;;  %v338_v23 = vld [vmem:[%s945_s19 + $0x28] sm:$0xff]  ;;  %v297_v24 = vld [vmem:[#allocation6 + $0x10] sm:$0xff]  ;;  %v337_v25 = vld [vmem:[%s945_s19 + $0x20] sm:$0xff] }
  0x35   : > { %315 = vmatpush.msra.mxu0 %v306_v5  ;;  %v296_v26 = vld [vmem:[#allocation6 + $0x8] sm:$0xff]  ;;  %v336_v27 = vld [vmem:[%s945_s19 + $0x18] sm:$0xff]  ;;  %v295_v28 = vld [vmem:[#allocation6] sm:$0xff]  ;;  %p720_p11 = pneg %p719_p7 }
  0x36   : > { %353 = vmatpush.msra.mxu1 %v344_v11  ;;  %v294_v29 = vld [vmem:[%s934_s8] sm:$0xff]  ;;  %v334_v31 = vld [vmem:[%s945_s19 + $0x8] sm:$0xff]  ;;  %v333_v32 = vld [vmem:[%s945_s19] sm:$0xff] }
  0x37   : > { %316 = vmatpush.msra.mxu0 %v305_v8  ;;  %v335_v30 = vld [vmem:[%s945_s19 + $0x10] sm:$0xff]  ;;  %p725_p1 = pnand %p724_p0, %p720_p11 }
  0x38   : > { %354 = vmatpush.msra.mxu1 %v343_v13 }
  0x39   : > { %317 = vmatpush.msra.mxu0 %v304_v10 }
  0x3a   : > { %355 = vmatpush.msra.mxu1 %v342_v15 }
  0x3b   : > { %318 = vmatpush.msra.mxu0 %v303_v12 }
  0x3c   : > { %356 = vmatpush.msra.mxu1 %v341_v17 }
  0x3d   : > { %319 = vmatpush.msra.mxu0 %v302_v14 }
  0x3e   : > { %357 = vmatpush.msra.mxu1 %v340_v19 }
  0x3f   : > { %320 = vmatpush.msra.mxu0 %v301_v16 }
  0x40   : > { %358 = vmatpush.msra.mxu1 %v339_v21 }
  0x41   : > { %321 = vmatpush.msra.mxu0 %v300_v18 }
  0x42   : > { %359 = vmatpush.msra.mxu1 %v338_v23 }
  0x43   : > { %322 = vmatpush.msra.mxu0 %v299_v20 }
  0x44   : > { %360 = vmatpush.msra.mxu1 %v337_v25 }
  0x45   : > { %323 = vmatpush.msra.mxu0 %v298_v22 }
  0x46   : > { %361 = vmatpush.msra.mxu1 %v336_v27 }
  0x47   : > { %324 = vmatpush.msra.mxu0 %v297_v24 }
  0x48   : > { %362 = vmatpush.msra.mxu1 %v335_v30 }
  0x49   : > { %325 = vmatpush.msra.mxu0 %v296_v26 }
  0x4a   : > { %363 = vmatpush.msra.mxu1 %v334_v31 }
  0x4b   : > { %326 = vmatpush.msra.mxu0 %v295_v28 }
  0x4c   : > { %327 = vmatmul.f32.vlgmr.msra.gmra.mxu0 %v294_v29  ;;  %364 = vmatpush.msra.mxu1 %v333_v32 }
  0xc9   : > { %v328_v33 = vpop.f32.mrf.mxu0 }
  0xca   : > { %365 = vmatmul.f32.vlgmr.msra.gmra.mxu1 %v328_v33 }
 0x147   : > { %v366_v34 = vpop.f32.mrf.mxu1 }
 0x148   : > { %369 = vst [vmem:[%s289_s27] sm:$0xff] %v366_v34 }
 0x149   : > { %728 = shalt.err (!%p725_p1)
}
 0x14a   : > { %539 = dma.vmem_to_hbm [thread:$0]  (%p866_p8), %s387_s6, 128, %s389_s9, %s371_s11  }
 0x14b PF: > { %s400_s28 = sand.u32 1, %s771_s12   ;;  %p553_p2 = pnand %p515_p10, %p873_p9 }
 0x14c   : > { %s401_s10 = scalar_lea.sflag [#allocation5], %s400_s28 }
 0x14d   : > { %p554_p4 = pneg %p553_p2 }
 0x14f   : > { %766 = dma.done.wait (%p554_p4), %s401_s10, 128  }
 0x150   : > { %768 = vsyncadd (%p554_p4), %s401_s10, 4294967168  ;;  %s20_s17 = sadd.s32 1, %s791_s17   ;;  %s1018_s12 = smov %s775_s13 }
 0x151   : > { %p17_p5 = scmp.ge.s32.totalorder %s20_s17, 4   ;;  %s1019_s13 = smov %s779_s14 }
 0x152   : > { %s1020_s14 = smov %s878_s26  ;;  %s1021_s15 = smov %s787_s16 }
 0x153   : > { %s1022_s16 = smov %s1024_s20  ;;  %19 = sbr.rel (!%p17_p5) target bundleno = 7 (0x7), region = 97 }
 0x158   :  { %407 = vsyncpa [#allocation4], 1 }
 0x159   :  { %409 = vsyncpa [#allocation4 + $0x1], 1 }
 0x15a   :  { %410 = vsyncpa [#allocation7], 1 }
 0x15b   :  { %411 = vsyncpa [#allocation5], 1 }
 0x15c   :  { %413 = vsyncpa [#allocation5 + $0x1], 1 }

</bundles_post_ra>
